<compile_context>
chip_gen: v7x
topology: tpu7x:2x2x1
jax: 0.10.0
libtpu: 0.0.40
codegen_flags: <defaults>
</compile_context>

<pallas_src>
import functools

import jax
import jax.numpy as jnp
from jax.experimental import pallas as pl
from jax.experimental.pallas import tpu as pltpu

LEAKY_SLOPE = 0.01   # nn.LeakyReLU default negative slope
LN_EPS = 1e-5        # nn.LayerNorm default eps
_MIB = 1024 * 1024


def _mp_norm(x, gamma_b, beta_b):
    """x: (Bb, N, D) f32; gamma_b/beta_b: (1, 1, D) f32 or None."""
    mu = jnp.mean(x, axis=1, keepdims=True)              # mean over token axis
    a = x * mu                                            # (Bb, N, D)
    a = jnp.where(a >= 0, a, LEAKY_SLOPE * a)             # LeakyReLU
    # Dropout: eval-mode identity.
    m = jnp.mean(a, axis=-1, keepdims=True)               # LayerNorm over D
    var = jnp.mean((a - m) * (a - m), axis=-1, keepdims=True)
    a = (a - m) * jax.lax.rsqrt(var + LN_EPS)
    if gamma_b is None:                                    # identity affine
        return a
    return a * gamma_b + beta_b


def base_mean_kernel(x_ref, gamma_ref, beta_ref, out_ref, *, apply_affine):
    # x_ref: (Bb, N, D); gamma_ref/beta_ref: (1, D); out_ref: (Bb, N-1, 2*D)
    x = x_ref[...].astype(jnp.float32)
    D = x.shape[-1]

    if apply_affine:
        # Reshape once here so the (1,1,D) views are shared by both norm calls.
        gamma_b = gamma_ref[...].astype(jnp.float32).reshape(1, 1, D)
        beta_b = beta_ref[...].astype(jnp.float32).reshape(1, 1, D)
    else:
        gamma_b = None
        beta_b = None

    adj1 = _mp_norm(x, gamma_b, beta_b)        # first base_mp_norm
    adj2 = _mp_norm(adj1, gamma_b, beta_b)     # second base_mp_norm (same params)

    # Row-0 drop done here; two direct stores into the lane halves of the
    # output block (no full (bb, N, 2D) concat temporary).
    out_ref[:, :, :D] = adj1[:, 1:, :].astype(out_ref.dtype)
    out_ref[:, :, D:] = adj2[:, 1:, :].astype(out_ref.dtype)


def _tpu_generation_params():
    """(vmem_capacity_bytes, num_tensorcores) with safe fallbacks."""
    vmem_bytes = 128 * _MIB
    num_cores = 1
    try:
        info = pltpu.get_tpu_info()
        vmem_bytes = int(getattr(info, "vmem_capacity_bytes", vmem_bytes))
    except Exception:
        pass
    try:
        kind = jax.devices()[0].device_kind.lower()
        if "v7" in kind:   # v7x: 2 TensorCores per chip
            num_cores = 2
    except Exception:
        pass
    return vmem_bytes, num_cores


def _choose_batch_block(B, N, D, budget_bytes, num_cores):
    """Largest divisor of B whose per-step working set stays within budget."""
    # Live f32 set per batch element: x, adj1, adj2, both output halves, temps.
    per_batch_bytes = 7 * N * D * 4
    cap = max(1, budget_bytes // max(per_batch_bytes, 1))
    if num_cores >= 2 and B >= num_cores:
        cap = min(cap, B // num_cores)   # only force >=num_cores steps on 2-TC
    cap = min(cap, B)
    divisors = [bb for bb in range(1, cap + 1) if B % bb == 0]
    if not divisors:
        return 1
    if num_cores >= 2:
        balanced = [bb for bb in divisors if (B // bb) % num_cores == 0]
        if balanced:
            return max(balanced)   # keep both TCs busy every pair of steps
    return max(divisors)


def base_mean_w_id_2_0_5(embeddings, gamma, beta, *, identity_affine=False):
    """embeddings: (B, N, D); gamma/beta: (D,). Returns (B, N-1, 2*D)."""
    B, N, D = embeddings.shape
    if N <= 1:
        return jnp.zeros((B, max(N - 1, 0), 2 * D), dtype=embeddings.dtype)

    gamma2d = gamma.reshape(1, D)
    beta2d = beta.reshape(1, D)

    vmem_bytes, num_cores = _tpu_generation_params()
    # Resident-block budget: ~16 MiB on 128-MiB parts, ~8 MiB on 64-MiB parts.
    budget = max(8 * _MIB, min(24 * _MIB, vmem_bytes // 8))
    bb = _choose_batch_block(B, N, D, budget, num_cores)

    itemsize = embeddings.dtype.itemsize
    in_block_bytes = 2 * bb * N * D * itemsize              # double-buffered in
    out_block_bytes = 2 * bb * (N - 1) * 2 * D * itemsize   # double-buffered out
    # Scoped-VMEM cap: ~40 MiB on 64-MiB-VMEM parts (v7x), 48 MiB on 128-MiB.
    vmem_cap = min(48 * _MIB, (vmem_bytes * 5) // 8)
    vmem_limit = int(min(vmem_cap,
                         max(32 * _MIB, 4 * (in_block_bytes + out_block_bytes))))

    kernel = functools.partial(base_mean_kernel,
                               apply_affine=not identity_affine)

    return pl.pallas_call(
        kernel,
        out_shape=jax.ShapeDtypeStruct((B, N - 1, 2 * D), embeddings.dtype),
        grid_spec=pltpu.PrefetchScalarGridSpec(
            num_scalar_prefetch=0,
            grid=(B // bb,),
            in_specs=[
                pl.BlockSpec((bb, N, D), lambda b: (b, 0, 0)),
                pl.BlockSpec((1, D), lambda b: (0, 0)),
                pl.BlockSpec((1, D), lambda b: (0, 0)),
            ],
            out_specs=pl.BlockSpec((bb, N - 1, 2 * D), lambda b: (b, 0, 0)),
        ),
        compiler_params=pltpu.CompilerParams(
            dimension_semantics=("parallel",),
            vmem_limit_bytes=vmem_limit,
        ),
    )(embeddings, gamma2d, beta2d)


def _reference(embeddings, gamma, beta):
    """Pure-JAX reference mirroring the PyTorch forward (eval mode)."""
    def mp(x):
        mu = jnp.mean(x, axis=1, keepdims=True)
        a = x * mu
        a = jnp.where(a >= 0, a, LEAKY_SLOPE * a)
        m = jnp.mean(a, axis=-1, keepdims=True)
        v = jnp.mean((a - m) ** 2, axis=-1, keepdims=True)
        a = (a - m) / jnp.sqrt(v + LN_EPS)
        return a * gamma + beta
    adj1 = mp(embeddings)
    adj2 = mp(adj1)
    return jnp.concatenate((adj1[:, 1:, :], adj2[:, 1:, :]), axis=-1)


if __name__ == "__main__":
    B, N, D = 2, 8, 32  # em_dim = 32

    key = jax.random.PRNGKey(0)
    embeddings = jax.random.normal(key, (B, N, D), dtype=jnp.float32)

    # Deterministic LayerNorm params (matches nn.LayerNorm default init).
    gamma = jnp.ones((D,), dtype=jnp.float32)
    beta = jnp.zeros((D,), dtype=jnp.float32)

    ref = _reference(embeddings, gamma, beta)

    # General path (affine applied in-kernel).
    out = base_mean_w_id_2_0_5(embeddings, gamma, beta)
    out = jax.block_until_ready(out)
    assert out.shape == (B, N - 1, 2 * D), out.shape
    assert jnp.allclose(out, ref, atol=1e-4, rtol=1e-4), "mismatch vs reference"

    # Specialized path (gamma=1 / beta=0 -> affine skipped inside the kernel).
    out_id = base_mean_w_id_2_0_5(embeddings, gamma, beta, identity_affine=True)
    out_id = jax.block_until_ready(out_id)
    assert jnp.allclose(out_id, ref, atol=1e-4, rtol=1e-4), "identity-affine mismatch"

    print("KERNEL_OK")
</pallas_src>

<mosaic_0001>
module attributes {stable_mosaic.version = 11 : i64} {
  func.func @base_mean_kernel(%arg0: i32, %arg1: memref<2x8x32xf32, #tpu.memory_space<vmem>>, %arg2: memref<1x32xf32, #tpu.memory_space<vmem>>, %arg3: memref<1x32xf32, #tpu.memory_space<vmem>>, %arg4: memref<2x7x64xf32, #tpu.memory_space<vmem>>) attributes {dimension_semantics = [#tpu.dimension_semantics<parallel>], iteration_bounds = array<i64: 1>, scalar_prefetch = 0 : i64, scratch_operands = 0 : i64, tpu.core_type = #tpu.core_type<tc>, window_params = [{transform_indices = @transform_0, window_bounds = array<i64: 2, 8, 32>}, {pipeline_mode = #tpu.pipeline_mode<synchronous>, transform_indices = @transform_1, window_bounds = array<i64: 1, 32>}, {pipeline_mode = #tpu.pipeline_mode<synchronous>, transform_indices = @transform_2, window_bounds = array<i64: 1, 32>}, {transform_indices = @transform_3, window_bounds = array<i64: 2, 7, 64>}]} {
    %c0 = arith.constant 0 : index
    %c0_0 = arith.constant 0 : index
    %c0_1 = arith.constant 0 : index
    %0 = vector.load %arg1[%c0, %c0_0, %c0_1] : memref<2x8x32xf32, #tpu.memory_space<vmem>>, vector<2x8x32xf32>
    %c0_2 = arith.constant 0 : index
    %c0_3 = arith.constant 0 : index
    %1 = vector.load %arg2[%c0_2, %c0_3] : memref<1x32xf32, #tpu.memory_space<vmem>>, vector<1x32xf32>
    %2 = vector.shape_cast %1 : vector<1x32xf32> to vector<1x1x32xf32>
    %c0_4 = arith.constant 0 : index
    %c0_5 = arith.constant 0 : index
    %3 = vector.load %arg3[%c0_4, %c0_5] : memref<1x32xf32, #tpu.memory_space<vmem>>, vector<1x32xf32>
    %4 = vector.shape_cast %3 : vector<1x32xf32> to vector<1x1x32xf32>
    %cst = arith.constant dense<0.000000e+00> : vector<2x32xf32>
    %5 = vector.multi_reduction <add>, %0, %cst [1] : vector<2x8x32xf32> to vector<2x32xf32>
    %6 = vector.shape_cast %5 : vector<2x32xf32> to vector<2x1x32xf32>
    %cst_6 = arith.constant 8.000000e+00 : f32
    %7 = vector.broadcast %cst_6 : f32 to vector<2x1x32xf32>
    %8 = arith.divf %6, %7 : vector<2x1x32xf32>
    %9 = vector.broadcast %8 : vector<2x1x32xf32> to vector<2x8x32xf32>
    %10 = arith.mulf %0, %9 : vector<2x8x32xf32>
    %cst_7 = arith.constant 0.000000e+00 : f32
    %11 = vector.broadcast %cst_7 : f32 to vector<2x8x32xf32>
    %12 = arith.cmpf oge, %10, %11 : vector<2x8x32xf32>
    %cst_8 = arith.constant 0.00999999977 : f32
    %13 = vector.broadcast %cst_8 : f32 to vector<2x8x32xf32>
    %14 = arith.mulf %13, %10 : vector<2x8x32xf32>
    %15 = arith.select %12, %10, %14 : vector<2x8x32xi1>, vector<2x8x32xf32>
    %cst_9 = arith.constant dense<0.000000e+00> : vector<2x8xf32>
    %16 = vector.multi_reduction <add>, %15, %cst_9 [2] : vector<2x8x32xf32> to vector<2x8xf32>
    %17 = vector.shape_cast %16 : vector<2x8xf32> to vector<2x8x1xf32>
    %cst_10 = arith.constant 3.200000e+01 : f32
    %18 = vector.broadcast %cst_10 : f32 to vector<2x8x1xf32>
    %19 = arith.divf %17, %18 : vector<2x8x1xf32>
    %20 = vector.broadcast %19 : vector<2x8x1xf32> to vector<2x8x32xf32>
    %21 = arith.subf %15, %20 : vector<2x8x32xf32>
    %22 = vector.broadcast %19 : vector<2x8x1xf32> to vector<2x8x32xf32>
    %23 = arith.subf %15, %22 : vector<2x8x32xf32>
    %24 = arith.mulf %21, %23 : vector<2x8x32xf32>
    %cst_11 = arith.constant dense<0.000000e+00> : vector<2x8xf32>
    %25 = vector.multi_reduction <add>, %24, %cst_11 [2] : vector<2x8x32xf32> to vector<2x8xf32>
    %26 = vector.shape_cast %25 : vector<2x8xf32> to vector<2x8x1xf32>
    %cst_12 = arith.constant 3.200000e+01 : f32
    %27 = vector.broadcast %cst_12 : f32 to vector<2x8x1xf32>
    %28 = arith.divf %26, %27 : vector<2x8x1xf32>
    %29 = vector.broadcast %19 : vector<2x8x1xf32> to vector<2x8x32xf32>
    %30 = arith.subf %15, %29 : vector<2x8x32xf32>
    %cst_13 = arith.constant 9.99999974E-6 : f32
    %31 = vector.broadcast %cst_13 : f32 to vector<2x8x1xf32>
    %32 = arith.addf %28, %31 : vector<2x8x1xf32>
    %33 = math.rsqrt %32 : vector<2x8x1xf32>
    %34 = vector.broadcast %33 : vector<2x8x1xf32> to vector<2x8x32xf32>
    %35 = arith.mulf %30, %34 : vector<2x8x32xf32>
    %36 = vector.broadcast %2 : vector<1x1x32xf32> to vector<2x8x32xf32>
    %37 = arith.mulf %35, %36 : vector<2x8x32xf32>
    %38 = vector.broadcast %4 : vector<1x1x32xf32> to vector<2x8x32xf32>
    %39 = arith.addf %37, %38 : vector<2x8x32xf32>
    %cst_14 = arith.constant dense<0.000000e+00> : vector<2x32xf32>
    %40 = vector.multi_reduction <add>, %39, %cst_14 [1] : vector<2x8x32xf32> to vector<2x32xf32>
    %41 = vector.shape_cast %40 : vector<2x32xf32> to vector<2x1x32xf32>
    %cst_15 = arith.constant 8.000000e+00 : f32
    %42 = vector.broadcast %cst_15 : f32 to vector<2x1x32xf32>
    %43 = arith.divf %41, %42 : vector<2x1x32xf32>
    %44 = vector.broadcast %43 : vector<2x1x32xf32> to vector<2x8x32xf32>
    %45 = arith.mulf %39, %44 : vector<2x8x32xf32>
    %cst_16 = arith.constant 0.000000e+00 : f32
    %46 = vector.broadcast %cst_16 : f32 to vector<2x8x32xf32>
    %47 = arith.cmpf oge, %45, %46 : vector<2x8x32xf32>
    %cst_17 = arith.constant 0.00999999977 : f32
    %48 = vector.broadcast %cst_17 : f32 to vector<2x8x32xf32>
    %49 = arith.mulf %48, %45 : vector<2x8x32xf32>
    %50 = arith.select %47, %45, %49 : vector<2x8x32xi1>, vector<2x8x32xf32>
    %cst_18 = arith.constant dense<0.000000e+00> : vector<2x8xf32>
    %51 = vector.multi_reduction <add>, %50, %cst_18 [2] : vector<2x8x32xf32> to vector<2x8xf32>
    %52 = vector.shape_cast %51 : vector<2x8xf32> to vector<2x8x1xf32>
    %cst_19 = arith.constant 3.200000e+01 : f32
    %53 = vector.broadcast %cst_19 : f32 to vector<2x8x1xf32>
    %54 = arith.divf %52, %53 : vector<2x8x1xf32>
    %55 = vector.broadcast %54 : vector<2x8x1xf32> to vector<2x8x32xf32>
    %56 = arith.subf %50, %55 : vector<2x8x32xf32>
    %57 = vector.broadcast %54 : vector<2x8x1xf32> to vector<2x8x32xf32>
    %58 = arith.subf %50, %57 : vector<2x8x32xf32>
    %59 = arith.mulf %56, %58 : vector<2x8x32xf32>
    %cst_20 = arith.constant dense<0.000000e+00> : vector<2x8xf32>
    %60 = vector.multi_reduction <add>, %59, %cst_20 [2] : vector<2x8x32xf32> to vector<2x8xf32>
    %61 = vector.shape_cast %60 : vector<2x8xf32> to vector<2x8x1xf32>
    %cst_21 = arith.constant 3.200000e+01 : f32
    %62 = vector.broadcast %cst_21 : f32 to vector<2x8x1xf32>
    %63 = arith.divf %61, %62 : vector<2x8x1xf32>
    %64 = vector.broadcast %54 : vector<2x8x1xf32> to vector<2x8x32xf32>
    %65 = arith.subf %50, %64 : vector<2x8x32xf32>
    %cst_22 = arith.constant 9.99999974E-6 : f32
    %66 = vector.broadcast %cst_22 : f32 to vector<2x8x1xf32>
    %67 = arith.addf %63, %66 : vector<2x8x1xf32>
    %68 = math.rsqrt %67 : vector<2x8x1xf32>
    %69 = vector.broadcast %68 : vector<2x8x1xf32> to vector<2x8x32xf32>
    %70 = arith.mulf %65, %69 : vector<2x8x32xf32>
    %71 = vector.broadcast %2 : vector<1x1x32xf32> to vector<2x8x32xf32>
    %72 = arith.mulf %70, %71 : vector<2x8x32xf32>
    %73 = vector.broadcast %4 : vector<1x1x32xf32> to vector<2x8x32xf32>
    %74 = arith.addf %72, %73 : vector<2x8x32xf32>
    %75 = vector.extract_strided_slice %39 {offsets = [0, 1, 0], sizes = [2, 7, 32], strides = [1, 1, 1]} : vector<2x8x32xf32> to vector<2x7x32xf32>
    %c0_23 = arith.constant 0 : index
    %c0_24 = arith.constant 0 : index
    %c0_25 = arith.constant 0 : index
    %76 = vector.load %arg4[%c0_23, %c0_24, %c0_25] : memref<2x7x64xf32, #tpu.memory_space<vmem>>, vector<2x7x32xf32>
    tpu.vector_store %arg4[%c0_23, %c0_24, %c0_25], %75 {strides = array<i32>} : memref<2x7x64xf32, #tpu.memory_space<vmem>>, vector<2x7x32xf32>,
    %77 = vector.extract_strided_slice %74 {offsets = [0, 1, 0], sizes = [2, 7, 32], strides = [1, 1, 1]} : vector<2x8x32xf32> to vector<2x7x32xf32>
    %c0_26 = arith.constant 0 : index
    %c0_27 = arith.constant 0 : index
    %c32 = arith.constant 32 : index
    %78 = vector.load %arg4[%c0_26, %c0_27, %c32] : memref<2x7x64xf32, #tpu.memory_space<vmem>>, vector<2x7x32xf32>
    tpu.vector_store %arg4[%c0_26, %c0_27, %c32], %77 {strides = array<i32>} : memref<2x7x64xf32, #tpu.memory_space<vmem>>, vector<2x7x32xf32>,
    return
  }
  func.func @transform_0(%arg0: i32) -> (i32, i32, i32) {
    %c0_i32 = arith.constant 0 : i32
    %c0_i32_0 = arith.constant 0 : i32
    %c0_i32_1 = arith.constant 0 : i32
    return %arg0, %c0_i32, %c0_i32_0 : i32, i32, i32
  }
  func.func @transform_1(%arg0: i32) -> (i32, i32) {
    %c0_i32 = arith.constant 0 : i32
    %c0_i32_0 = arith.constant 0 : i32
    %c0_i32_1 = arith.constant 0 : i32
    return %c0_i32, %c0_i32_0 : i32, i32
  }
  func.func @transform_2(%arg0: i32) -> (i32, i32) {
    %c0_i32 = arith.constant 0 : i32
    %c0_i32_0 = arith.constant 0 : i32
    %c0_i32_1 = arith.constant 0 : i32
    return %c0_i32, %c0_i32_0 : i32, i32
  }
  func.func @transform_3(%arg0: i32) -> (i32, i32, i32) {
    %c0_i32 = arith.constant 0 : i32
    %c0_i32_0 = arith.constant 0 : i32
    %c0_i32_1 = arith.constant 0 : i32
    return %arg0, %c0_i32, %c0_i32_0 : i32, i32, i32
  }
}

</mosaic_0001>

<bundles_post_ra>
// kernel: tpu_custom_call.1
= control target key start
LH: loop header
LB: loop body
LE: loop exit
PB: predicated region body
PF: predicated region fallthrough
CT: control target
= control target key end

     0   :  { %8 = vsyncpa [#allocation3], 0  ;;  %s212_s12 = smov [#allocation2]   ;;  %s290_s0 = inlined_call_operand.hbm [shape: f32[2,8,32], index: 0, kind: input, shape index: {}]   ;;  %s291_s1 = inlined_call_operand.vmem [shape: f32[1,32], index: 1, kind: input, shape index: {}]   ;;  %s292_s2 = inlined_call_operand.vmem [shape: f32[1,32], index: 2, kind: input, shape index: {}]   ;;  %s293_s3 = inlined_call_operand.vmem [shape: f32[2,7,64], index: 3, kind: output, shape index: {}]  }
   0x1   :  { %s14_s13 = sshll.u32 %s212_s12, 4  ;;  %s188_s16 = scalar_lea.hbm %s290_s0, 256  ;;  %s15_s13 = int_to_ptr.vmem [resolvable:$true] %s14_s13 }
   0x2   :  { %p189_p0 = scmp.ne.s32.totalorder %s290_s0, %s188_s16  ;;  %p192_p1 = scmp.lt.u32.totalorder %s188_s16, %s290_s0 }
   0x4   :  { %p194_p2 = pnand %p192_p1, %p189_p0 }
   0x6   :  { %197 = shalt.err (!%p194_p2)
}
   0x7   :  { %s198_s21 = scalar_lea.vmem %s15_s13, 256  ;;  %p203_p4 = scmp.lt.s32.totalorder %s15_s13, %s15_s13 }
   0x8   :  { %p199_p3 = scmp.ne.s32.totalorder %s15_s13, %s198_s21  ;;  %p204_p5 = scmp.lt.s32.totalorder %s198_s21, %s198_s21 }
   0xa   :  { %p205_p6 = por %p204_p5, %p203_p4 }
   0xc   :  { %p206_p7 = pnand %p205_p6, %p199_p3 }
   0xe   :  { %209 = shalt.err (!%p206_p7)
}
   0xf   :  { %s213_s22 = smov 128   ;;  %s214_s23 = smov 8  }
  0x10   :  { %20 = dma.hbm_to_vmem [thread:$0]  %s290_s0, 256, %s15_s13, [#allocation3], %s213_s22, %s213_s22, %s214_s23  }
  0x11   :  { %210 = dma.done.wait [#allocation3], 256  }
  0x12   :  { %211 = vsyncadd [#allocation3], 4294967040  ;;  %vm32_vm0 = vcmask 261120   ;;  %v28_v0 = vld [vmem:[#allocation2] sm:$0xff]  ;;  %v29_v1 = vld [vmem:[#allocation2 + $0x8] sm:$0xff]  ;;  %vm155_vm3 = vcmask 261121  }
  0x13   :  { %v33_v2 = vsel %vm32_vm0, %v28_v0, 0.0  ;;  %v40_v3 = vsel %vm32_vm0, %v29_v1, 0.0  ;;  %v257_v43 = vld [vmem:[%s291_s1] ss:$0 sm:$0xff]  ;;  %s215_s4 = smov 32   ;;  %vm166_vm6 = vcmask 523521  }
  0x14   :  { %v34_v4 = vrot.slane %v33_v2, 4  ;;  %v41_v5 = vrot.slane %v40_v3, 4  ;;  %v262_v45 = vld [vmem:[%s292_s2] ss:$0 sm:$0xff] }
  0x16   :  { %v35_v6 = vadd.f32 %v34_v4, %v33_v2  ;;  %v42_v7 = vadd.f32 %v41_v5, %v40_v3 }
  0x18   :  { %v36_v8 = vrot.slane %v35_v6, 2  ;;  %v43_v9 = vrot.slane %v42_v7, 2 }
  0x1a   :  { %v37_v10 = vadd.f32 %v36_v8, %v35_v6  ;;  %v44_v11 = vadd.f32 %v43_v9, %v42_v7 }
  0x1c   :  { %v38_v12 = vrot.slane %v37_v10, 1  ;;  %v45_v13 = vrot.slane %v44_v11, 1 }
  0x1e   :  { %v39_v14 = vadd.f32 %v38_v12, %v37_v10  ;;  %v46_v15 = vadd.f32 %v45_v13, %v44_v11 }
  0x20   :  { %v48_v16 = vmul.f32 0.125, %v39_v14  ;;  %v49_v17 = vmul.f32 0.125, %v46_v15 }
  0x22   :  { %v50_v18 = vmul.f32 %v48_v16, %v28_v0  ;;  %v51_v19 = vmul.f32 %v49_v17, %v29_v1 }
  0x24   :  { %vm52_vm1 = vcmp.ge.f32.partialorder %v50_v18, 0.0  ;;  %v54_v20 = vmul.f32 0.01, %v50_v18  ;;  %vm53_vm2 = vcmp.ge.f32.partialorder %v51_v19, 0.0  ;;  %v55_v21 = vmul.f32 0.01, %v51_v19 }
  0x26   :  { %v56_v22 = vsel %vm52_vm1, %v50_v18, %v54_v20  ;;  %v57_v23 = vsel %vm53_vm2, %v51_v19, %v55_v21 }
  0x27   :  { %v58_v24 = vsel %vm32_vm0, %v56_v22, 0.0  ;;  %v61_v25 = vsel %vm32_vm0, %v57_v23, 0.0 }
  0x28   :  { %59 = vadd.xlane.f32.xlu0 %v58_v24 }
  0x2c   :  { %62 = vadd.xlane.f32.xlu0 %v61_v25 }
  0xb5   :  { %v60_v26 = vpop.xlane.xlu0 %59 }
  0xb6   :  { %v65_v27 = vmul.f32 0.03125, %v60_v26 }
  0xb8   :  { %v67_v28 = vsub.f32 %v56_v22, %v65_v27 }
  0xb9   :  { %v63_v29 = vpop.xlane.xlu0 %62 }
  0xba   :  { %v66_v30 = vmul.f32 0.03125, %v63_v29  ;;  %v69_v31 = vmul.f32 %v67_v28, %v67_v28 }
  0xbc   :  { %v68_v32 = vsub.f32 %v57_v23, %v66_v30  ;;  %v71_v33 = vsel %vm32_vm0, %v69_v31, 0.0 }
  0xbd   :  { %72 = vadd.xlane.f32.xlu1 %v71_v33 }
  0xbe   :  { %v70_v34 = vmul.f32 %v68_v32, %v68_v32 }
  0xc0   :  { %v74_v35 = vsel %vm32_vm0, %v70_v34, 0.0 }
  0xc1   :  { %75 = vadd.xlane.f32.xlu1 %v74_v35 }
 0x14a   :  { %v73_v36 = vpop.xlane.xlu1 %72 }
 0x14b   :  { %v77_v37 = vmul.f32 0.03125, %v73_v36 }
 0x14d   :  { %v79_v38 = vadd.f32 1e-05, %v77_v37 }
 0x14e   :  { %v76_v39 = vpop.xlane.xlu1 %75 }
 0x14f   :  { %180 = vrsqrt.f32 %v79_v38  ;;  %v78_v40 = vmul.f32 0.03125, %v76_v39 }
 0x151   :  { %v80_v41 = vadd.f32 1e-05, %v78_v40 }
 0x153   :  { %182 = vrsqrt.f32 %v80_v41 }
 0x159   :  { %v181_v42 = vpop.eup %180 }
 0x15a   :  { %v83_v44 = vmul.f32 %v181_v42, %v67_v28 }
 0x15c   :  { %v91_v46 = vmul.f32 %v257_v43, %v83_v44 }
 0x15d   :  { %v183_v47 = vpop.eup %182 }
 0x15e   :  { %v84_v48 = vmul.f32 %v183_v47, %v68_v32  ;;  %v99_v49 = vadd.f32 %v262_v45, %v91_v46 }
 0x160   :  { %v101_v50 = vsel %vm32_vm0, %v99_v49, 0.0  ;;  %v92_v51 = vmul.f32 %v257_v43, %v84_v48  ;;  %156 = vst.msk [vmem:[%s293_s3 - $0x1] sm:$0xfe] %vm155_vm3, %v99_v49 }
 0x161   :  { %v102_v52 = vrot.slane %v101_v50, 4 }
 0x162   :  { %v100_v53 = vadd.f32 %v262_v45, %v92_v51 }
 0x163   :  { %v103_v54 = vadd.f32 %v102_v52, %v101_v50 }
 0x164   :  { %v108_v55 = vsel %vm32_vm0, %v100_v53, 0.0  ;;  %157 = vst.msk [vmem:[%s293_s3 + $0x7] sm:$0xfe] %vm155_vm3, %v100_v53 }
 0x165   :  { %v104_v56 = vrot.slane %v103_v54, 2  ;;  %v109_v57 = vrot.slane %v108_v55, 4 }
 0x167   :  { %v105_v58 = vadd.f32 %v104_v56, %v103_v54  ;;  %v110_v59 = vadd.f32 %v109_v57, %v108_v55 }
 0x169   :  { %v106_v60 = vrot.slane %v105_v58, 1  ;;  %v111_v61 = vrot.slane %v110_v59, 2 }
 0x16b   :  { %v107_v62 = vadd.f32 %v106_v60, %v105_v58  ;;  %v112_v63 = vadd.f32 %v111_v61, %v110_v59 }
 0x16d   :  { %v115_v0 = vmul.f32 0.125, %v107_v62  ;;  %v113_v1 = vrot.slane %v112_v63, 1 }
 0x16f   :  { %v117_v2 = vmul.f32 %v115_v0, %v99_v49  ;;  %v114_v3 = vadd.f32 %v113_v1, %v112_v63 }
 0x171   :  { %vm119_vm4 = vcmp.ge.f32.partialorder %v117_v2, 0.0  ;;  %v121_v4 = vmul.f32 0.01, %v117_v2  ;;  %v116_v5 = vmul.f32 0.125, %v114_v3 }
 0x173   :  { %v123_v6 = vsel %vm119_vm4, %v117_v2, %v121_v4  ;;  %v118_v7 = vmul.f32 %v116_v5, %v100_v53 }
 0x174   :  { %v125_v8 = vsel %vm32_vm0, %v123_v6, 0.0 }
 0x175   :  { %126 = vadd.xlane.f32.xlu0 %v125_v8  ;;  %vm120_vm5 = vcmp.ge.f32.partialorder %v118_v7, 0.0  ;;  %v122_v9 = vmul.f32 0.01, %v118_v7 }
 0x177   :  { %v124_v10 = vsel %vm120_vm5, %v118_v7, %v122_v9 }
 0x178   :  { %v128_v11 = vsel %vm32_vm0, %v124_v10, 0.0 }
 0x179   :  { %129 = vadd.xlane.f32.xlu1 %v128_v11 }
 0x202   :  { %v127_v12 = vpop.xlane.xlu0 %126 }
 0x203   :  { %v131_v13 = vmul.f32 0.03125, %v127_v12 }
 0x205   :  { %v133_v14 = vsub.f32 %v123_v6, %v131_v13 }
 0x206   :  { %v130_v15 = vpop.xlane.xlu1 %129 }
 0x207   :  { %v132_v16 = vmul.f32 0.03125, %v130_v15  ;;  %v135_v17 = vmul.f32 %v133_v14, %v133_v14 }
 0x209   :  { %v134_v18 = vsub.f32 %v124_v10, %v132_v16  ;;  %v137_v19 = vsel %vm32_vm0, %v135_v17, 0.0 }
 0x20a   :  { %138 = vadd.xlane.f32.xlu0 %v137_v19 }
 0x20b   :  { %v136_v20 = vmul.f32 %v134_v18, %v134_v18 }
 0x20d   :  { %v140_v21 = vsel %vm32_vm0, %v136_v20, 0.0 }
 0x20e   :  { %141 = vadd.xlane.f32.xlu1 %v140_v21 }
 0x297   :  { %v139_v22 = vpop.xlane.xlu0 %138 }
 0x298   :  { %v143_v23 = vmul.f32 0.03125, %v139_v22 }
 0x29a   :  { %v145_v24 = vadd.f32 1e-05, %v143_v23 }
 0x29b   :  { %v142_v25 = vpop.xlane.xlu1 %141 }
 0x29c   :  { %184 = vrsqrt.f32 %v145_v24  ;;  %v144_v26 = vmul.f32 0.03125, %v142_v25 }
 0x29e   :  { %v146_v27 = vadd.f32 1e-05, %v144_v26 }
 0x2a0   :  { %186 = vrsqrt.f32 %v146_v27 }
 0x2a6   :  { %v185_v28 = vpop.eup %184 }
 0x2a7   :  { %v149_v29 = vmul.f32 %v185_v28, %v133_v14 }
 0x2a9   :  { %v151_v30 = vmul.f32 %v257_v43, %v149_v29 }
 0x2aa   :  { %v187_v31 = vpop.eup %186 }
 0x2ab   :  { %v153_v32 = vadd.f32 %v262_v45, %v151_v30  ;;  %v150_v33 = vmul.f32 %v187_v31, %v134_v18 }
 0x2ad   :  { %160 = vrot.lane.b32.xlu0 %v153_v32, %s215_s4  ;;  %v152_v34 = vmul.f32 %v257_v43, %v150_v33 }
 0x2af   :  { %v154_v35 = vadd.f32 %v262_v45, %v152_v34 }
 0x2b1   :  { %162 = vrot.lane.b32.xlu1 %v154_v35, %s215_s4 }
 0x31f   :  { %v161_v36 = vpop.permute.xlu0 %160 }
 0x320   :  { %167 = vst.msk [vmem:[%s293_s3 - $0x1] sm:$0xfe] %vm166_vm6, %v161_v36 }
 0x323   :  { %v163_v37 = vpop.permute.xlu1 %162 }
 0x324   :  { %168 = vst.msk [vmem:[%s293_s3 + $0x7] sm:$0xfe] %vm166_vm6, %v163_v37 }
 0x325   :  { %173 = vsyncpa [#allocation3], 1 }

</bundles_post_ra>
